<compile_context>
chip_gen: v5e
topology: v5e:2x2
jax: 0.10.0
libtpu: 0.0.40
codegen_flags: <defaults>
</compile_context>

<pallas_src>
import functools

import jax
import jax.numpy as jnp
from jax.experimental import pallas as pl
from jax.experimental.pallas import tpu as pltpu

TEMPERATURE = 0.5     # self.temperature
BN_EPS = 1e-5         # BatchNorm1d default eps
L2_EPS = 1e-12        # F.normalize default eps
NEG_BIG = -1e30       # large finite sentinel (more robust than -inf)


def simclr_loss_kernel(h_ref, w1_ref, g1_ref, b1_ref, w2_ref, g2_ref,
                       loss_ref, *, n, n_pad):
    """Projection head (per-view BN) + L2 normalize + NT-Xent on stacked views.

    h_ref layout: rows [0, n)          = hi (valid), rows [n, n_pad)      = 0,
                  rows [n_pad, n_pad+n) = hj (valid), rows [n_pad+n, 2n_pad)= 0.
    """
    two_n_pad = h_ref.shape[0]                 # 2 * n_pad (static)
    inv_n = jnp.float32(1.0 / n)
    inv_t = jnp.float32(1.0 / TEMPERATURE)

    row_ids = jax.lax.broadcasted_iota(jnp.int32, (two_n_pad, 1), 0)
    in_top = row_ids < n_pad                                   # view-i half
    valid = jnp.logical_or(
        row_ids < n,
        jnp.logical_and(row_ids >= n_pad, row_ids < n_pad + n))
    valid_f = valid.astype(jnp.float32)                        # (2n_pad, 1)

    def bn_stats(a):
        # Per-view batch statistics (training mode, biased variance).
        # Padded rows of `a` are exactly zero, so plain column sums divided by
        # the true n give the per-view mean, and E[x^2] - mu^2 gives the
        # biased variance without any extra masking.
        top = jnp.where(in_top, a, 0.0)
        bot = jnp.where(in_top, 0.0, a)
        mu_t = jnp.sum(top, axis=0, keepdims=True) * inv_n
        mu_b = jnp.sum(bot, axis=0, keepdims=True) * inv_n
        var_t = jnp.sum(top * top, axis=0, keepdims=True) * inv_n - mu_t * mu_t
        var_b = jnp.sum(bot * bot, axis=0, keepdims=True) * inv_n - mu_b * mu_b
        mu = jnp.where(in_top, mu_t, mu_b)
        var = jnp.where(in_top, var_t, var_b)
        return mu, var

    # ---- projection head on the stacked (2N, latent) features ----
    a1 = jnp.dot(h_ref[...], w1_ref[...],
                 preferred_element_type=jnp.float32)           # (2n_pad, P)
    mu1, var1 = bn_stats(a1)
    a1 = (a1 - mu1) * jax.lax.rsqrt(var1 + BN_EPS) * g1_ref[...] + b1_ref[...]
    a1 = jnp.maximum(a1, 0.0) * valid_f        # ReLU + re-zero padded rows

    a2 = jnp.dot(a1, w2_ref[...],
                 preferred_element_type=jnp.float32)           # (2n_pad, P)
    mu2, var2 = bn_stats(a2)
    a2 = (a2 - mu2) * jax.lax.rsqrt(var2 + BN_EPS) * g2_ref[...]  # center=False

    # F.normalize: multiply by rsqrt(max(sumsq, eps^2)) — no divide.
    sumsq = jnp.sum(a2 * a2, axis=1, keepdims=True)
    z = a2 * jax.lax.rsqrt(jnp.maximum(sumsq, jnp.float32(L2_EPS * L2_EPS)))

    # ---- NT-Xent on the stacked z: one (2N, 2N) similarity matmul ----
    sim = jax.lax.dot_general(z, z, (((1,), (1,)), ((), ())),
                              preferred_element_type=jnp.float32) * inv_t

    rows2 = jax.lax.broadcasted_iota(jnp.int32, (two_n_pad, two_n_pad), 0)
    cols2 = jax.lax.broadcasted_iota(jnp.int32, (two_n_pad, two_n_pad), 1)
    col_valid = jnp.logical_or(
        cols2 < n,
        jnp.logical_and(cols2 >= n_pad, cols2 < n_pad + n))
    keep = jnp.logical_and(col_valid, rows2 != cols2)   # drop pads + diagonal
    masked = jnp.where(keep, sim, jnp.float32(NEG_BIG))

    m = jnp.max(masked, axis=1, keepdims=True)
    lse = m + jnp.log(jnp.sum(jnp.exp(masked - m), axis=1, keepdims=True))

    # positive logits sim(zi_k, zj_k), computed directly (no masked gather);
    # each positive appears once per half of the batch.
    pos_half = jnp.sum(z[:n_pad, :] * z[n_pad:, :], axis=1,
                       keepdims=True) * inv_t                  # (n_pad, 1)
    pos_mask = (jax.lax.broadcasted_iota(jnp.int32, (n_pad, 1), 0)
                < n).astype(jnp.float32)

    lse_sum = jnp.sum(lse * valid_f, axis=0, keepdims=True)    # (1, 1)
    pos_sum = jnp.sum(pos_half * pos_mask, axis=0, keepdims=True)

    # cross_entropy(reduction='sum') / n  (dist=None branch)
    loss_ref[...] = (lse_sum - 2.0 * pos_sum) * inv_n


def simclr_forward(xi, xj, params):
    """Returns (loss, hi_features) mirroring SimCLR.forward for dist=None."""
    wenc, w1, g1, b1, w2, g2 = params
    n, cin, hh, ww = xi.shape
    latent = wenc.shape[1]
    p = w1.shape[1]

    # ---- encoder stand-in + global average pool, hoisted into XLA ----
    # The image tensors are the dominant HBM traffic and the K=Cin contraction
    # is far too small for the MXU; XLA handles both at roofline and only the
    # small (2N, latent) feature slab enters the Pallas kernel.
    # TODO(synk): the real ResNet-50 / CAFormer backbone is external and not
    # reproduced; a 1x1-conv-equivalent linear map is used (GAP commutes).
    pooled_i = jnp.mean(xi.reshape(n, cin, hh * ww).astype(jnp.float32), axis=2)
    pooled_j = jnp.mean(xj.reshape(n, cin, hh * ww).astype(jnp.float32), axis=2)
    hi = jnp.dot(pooled_i, wenc, preferred_element_type=jnp.float32)
    hj = jnp.dot(pooled_j, wenc, preferred_element_type=jnp.float32)

    # Pad the batch to a multiple of 8 so all f32 tiles are full (8,128) vregs
    # and stores are unmasked; stack the two views into one (2*n_pad, latent).
    n_pad = ((n + 7) // 8) * 8
    pad = n_pad - n
    hi_p = jnp.pad(hi, ((0, pad), (0, 0)))
    hj_p = jnp.pad(hj, ((0, pad), (0, 0)))
    h_stacked = jnp.concatenate([hi_p, hj_p], axis=0)          # (2*n_pad, latent)

    # Explicit VMEM budget (inputs + intermediates, ~3x headroom), well under
    # the 48 MiB that is safe on v7x (64 MiB physical).
    two_n = 2 * n_pad
    f32 = 4
    est_words = (two_n * latent + latent * p + p * p + 3 * p    # kernel inputs
                 + 3 * two_n * p                                # a1 / a2 / z
                 + 2 * two_n * two_n)                           # sim + mask tmp
    vmem_limit = min(48 << 20, max(3 * est_words * f32, 8 << 20))

    vmem = pltpu.MemorySpace.VMEM
    kernel = functools.partial(simclr_loss_kernel, n=n, n_pad=n_pad)
    loss = pl.pallas_call(
        kernel,
        out_shape=jax.ShapeDtypeStruct((1, 1), jnp.float32),
        in_specs=[pl.BlockSpec(memory_space=vmem)] * 6,
        out_specs=pl.BlockSpec(memory_space=vmem),
        compiler_params=pltpu.CompilerParams(vmem_limit_bytes=int(vmem_limit)),
    )(h_stacked, w1, g1, b1, w2, g2)
    return loss[0, 0], hi


def reference_forward(xi, xj, params):
    """Pure-JAX reference mirroring the PyTorch forward (dist=None branch)."""
    wenc, w1, g1, b1, w2, g2 = params
    n = xi.shape[0]

    def enc(x):
        pooled = jnp.mean(x.reshape(n, x.shape[1], -1), axis=2)
        return pooled @ wenc

    def proj(h):
        a1 = h @ w1
        mu = a1.mean(0); var = ((a1 - mu) ** 2).mean(0)
        a1 = (a1 - mu) / jnp.sqrt(var + BN_EPS) * g1[0] + b1[0]
        a1 = jnp.maximum(a1, 0.0)
        a2 = a1 @ w2
        mu = a2.mean(0); var = ((a2 - mu) ** 2).mean(0)
        a2 = (a2 - mu) / jnp.sqrt(var + BN_EPS) * g2[0]
        nrm = jnp.sqrt((a2 ** 2).sum(1, keepdims=True))
        return a2 / jnp.maximum(nrm, L2_EPS)

    hi, hj = enc(xi), enc(xj)
    zi, zj = proj(hi), proj(hj)
    z1 = jnp.concatenate([zi, zj], axis=0)
    sim = (z1 @ z1.T) / TEMPERATURE
    idx = jnp.arange(2 * n)
    sim = sim.at[idx, idx].set(-jnp.inf)
    targets = jnp.concatenate([jnp.arange(n, 2 * n), jnp.arange(n)])
    lse = jax.scipy.special.logsumexp(sim, axis=1)
    loss = jnp.sum(lse - sim[idx, targets]) / n
    return loss, hi


def _make_inputs(key, n, cin, hh, ww, latent, p):
    ks = jax.random.split(key, 5)
    xi = jax.random.normal(ks[0], (n, cin, hh, ww), jnp.float32)
    xj = jax.random.normal(ks[1], (n, cin, hh, ww), jnp.float32)
    wenc = jax.random.normal(ks[2], (cin, latent), jnp.float32) * 0.1
    w1 = jax.random.normal(ks[3], (latent, p), jnp.float32) * (latent ** -0.5)
    w2 = jax.random.normal(ks[4], (p, p), jnp.float32) * (p ** -0.5)
    g1 = jnp.ones((1, p), jnp.float32)
    b1 = jnp.zeros((1, p), jnp.float32)
    g2 = jnp.ones((1, p), jnp.float32)
    return xi, xj, (wenc, w1, g1, b1, w2, g2)


if __name__ == "__main__":
    # Small shapes consistent with the forward (two augmented views, NCHW).
    CIN, H, W = 3, 8, 8
    LATENT, P = 256, 128          # latent_dim (scaled down), projection_dim=128

    key = jax.random.PRNGKey(0)
    k_a, k_b = jax.random.split(key)

    # Case 1: batch already a multiple of 8 (no padding).
    xi, xj, params = _make_inputs(k_a, 8, CIN, H, W, LATENT, P)
    loss, hi = simclr_forward(xi, xj, params)
    jax.block_until_ready((loss, hi))
    ref_loss, ref_hi = reference_forward(xi, xj, params)
    assert bool(jnp.isfinite(loss)), "loss not finite"
    assert jnp.allclose(loss, ref_loss, rtol=2e-3, atol=2e-3), (loss, ref_loss)
    assert jnp.allclose(hi, ref_hi, rtol=2e-3, atol=2e-3), "feature mismatch"

    # Case 2: ragged batch (exercises the pad-to-8 + masking path).
    xi2, xj2, params2 = _make_inputs(k_b, 5, CIN, H, W, LATENT, P)
    loss2, hi2 = simclr_forward(xi2, xj2, params2)
    jax.block_until_ready((loss2, hi2))
    ref_loss2, ref_hi2 = reference_forward(xi2, xj2, params2)
    assert bool(jnp.isfinite(loss2)), "loss not finite (ragged)"
    assert jnp.allclose(loss2, ref_loss2, rtol=2e-3, atol=2e-3), (loss2, ref_loss2)
    assert jnp.allclose(hi2, ref_hi2, rtol=2e-3, atol=2e-3), "feature mismatch (ragged)"

    print("KERNEL_OK")
</pallas_src>

<mosaic_0001>
module attributes {stable_mosaic.version = 11 : i64} {
  func.func @simclr_loss_kernel(%arg0: memref<16x256xf32, #tpu.memory_space<vmem>>, %arg1: memref<256x128xf32, #tpu.memory_space<vmem>>, %arg2: memref<1x128xf32, #tpu.memory_space<vmem>>, %arg3: memref<1x128xf32, #tpu.memory_space<vmem>>, %arg4: memref<128x128xf32, #tpu.memory_space<vmem>>, %arg5: memref<1x128xf32, #tpu.memory_space<vmem>>, %arg6: memref<1x1xf32, #tpu.memory_space<vmem>>) attributes {dimension_semantics = [], scalar_prefetch = 0 : i64, scratch_operands = 0 : i64, tpu.core_type = #tpu.core_type<tc>} {
    %0 = tpu.iota {dimensions = array<i32: 0>} : vector<16x1xi32>
    %c8_i32 = arith.constant 8 : i32
    %1 = vector.broadcast %c8_i32 : i32 to vector<16x1xi32>
    %2 = arith.cmpi slt, %0, %1 : vector<16x1xi32>
    %c8_i32_0 = arith.constant 8 : i32
    %3 = vector.broadcast %c8_i32_0 : i32 to vector<16x1xi32>
    %4 = arith.cmpi slt, %0, %3 : vector<16x1xi32>
    %c8_i32_1 = arith.constant 8 : i32
    %5 = vector.broadcast %c8_i32_1 : i32 to vector<16x1xi32>
    %6 = arith.cmpi sge, %0, %5 : vector<16x1xi32>
    %c16_i32 = arith.constant 16 : i32
    %7 = vector.broadcast %c16_i32 : i32 to vector<16x1xi32>
    %8 = arith.cmpi slt, %0, %7 : vector<16x1xi32>
    %9 = arith.andi %6, %8 : vector<16x1xi1>
    %10 = arith.ori %4, %9 : vector<16x1xi1>
    %11 = arith.extui %10 : vector<16x1xi1> to vector<16x1xi32>
    %12 = arith.sitofp %11 : vector<16x1xi32> to vector<16x1xf32>
    %c0 = arith.constant 0 : index
    %c0_2 = arith.constant 0 : index
    %13 = vector.load %arg0[%c0, %c0_2] : memref<16x256xf32, #tpu.memory_space<vmem>>, vector<16x256xf32>
    %c0_3 = arith.constant 0 : index
    %c0_4 = arith.constant 0 : index
    %14 = vector.load %arg1[%c0_3, %c0_4] : memref<256x128xf32, #tpu.memory_space<vmem>>, vector<256x128xf32>
    %cst = arith.constant dense<0.000000e+00> : vector<16x128xf32>
    %15 = tpu.matmul %13, %14, %cst {dimension_numbers = #tpu.dot_dimension_numbers<[1], [0], [0], [1], [0, 0, 1, 1], [], []>} : vector<16x256xf32>, vector<256x128xf32>, vector<16x128xf32> -> vector<16x128xf32>
    %cst_5 = arith.constant 0.000000e+00 : f32
    %16 = vector.shape_cast %2 : vector<16x1xi1> to vector<16x1xi1>
    %17 = vector.broadcast %16 : vector<16x1xi1> to vector<16x128xi1>
    %18 = vector.broadcast %cst_5 : f32 to vector<16x128xf32>
    %19 = arith.select %17, %15, %18 : vector<16x128xi1>, vector<16x128xf32>
    %cst_6 = arith.constant 0.000000e+00 : f32
    %20 = vector.shape_cast %2 : vector<16x1xi1> to vector<16x1xi1>
    %21 = vector.broadcast %20 : vector<16x1xi1> to vector<16x128xi1>
    %22 = vector.broadcast %cst_6 : f32 to vector<16x128xf32>
    %23 = arith.select %21, %22, %15 : vector<16x128xi1>, vector<16x128xf32>
    %cst_7 = arith.constant dense<0.000000e+00> : vector<128xf32>
    %24 = vector.multi_reduction <add>, %19, %cst_7 [0] : vector<16x128xf32> to vector<128xf32>
    %25 = vector.shape_cast %24 : vector<128xf32> to vector<1x128xf32>
    %cst_8 = arith.constant 1.250000e-01 : f32
    %26 = vector.broadcast %cst_8 : f32 to vector<1x128xf32>
    %27 = arith.mulf %25, %26 : vector<1x128xf32>
    %cst_9 = arith.constant dense<0.000000e+00> : vector<128xf32>
    %28 = vector.multi_reduction <add>, %23, %cst_9 [0] : vector<16x128xf32> to vector<128xf32>
    %29 = vector.shape_cast %28 : vector<128xf32> to vector<1x128xf32>
    %cst_10 = arith.constant 1.250000e-01 : f32
    %30 = vector.broadcast %cst_10 : f32 to vector<1x128xf32>
    %31 = arith.mulf %29, %30 : vector<1x128xf32>
    %32 = arith.mulf %19, %19 : vector<16x128xf32>
    %cst_11 = arith.constant dense<0.000000e+00> : vector<128xf32>
    %33 = vector.multi_reduction <add>, %32, %cst_11 [0] : vector<16x128xf32> to vector<128xf32>
    %34 = vector.shape_cast %33 : vector<128xf32> to vector<1x128xf32>
    %cst_12 = arith.constant 1.250000e-01 : f32
    %35 = vector.broadcast %cst_12 : f32 to vector<1x128xf32>
    %36 = arith.mulf %34, %35 : vector<1x128xf32>
    %37 = arith.mulf %27, %27 : vector<1x128xf32>
    %38 = arith.subf %36, %37 : vector<1x128xf32>
    %39 = arith.mulf %23, %23 : vector<16x128xf32>
    %cst_13 = arith.constant dense<0.000000e+00> : vector<128xf32>
    %40 = vector.multi_reduction <add>, %39, %cst_13 [0] : vector<16x128xf32> to vector<128xf32>
    %41 = vector.shape_cast %40 : vector<128xf32> to vector<1x128xf32>
    %cst_14 = arith.constant 1.250000e-01 : f32
    %42 = vector.broadcast %cst_14 : f32 to vector<1x128xf32>
    %43 = arith.mulf %41, %42 : vector<1x128xf32>
    %44 = arith.mulf %31, %31 : vector<1x128xf32>
    %45 = arith.subf %43, %44 : vector<1x128xf32>
    %46 = vector.shape_cast %2 : vector<16x1xi1> to vector<16x1xi1>
    %47 = vector.broadcast %46 : vector<16x1xi1> to vector<16x128xi1>
    %48 = vector.shape_cast %27 : vector<1x128xf32> to vector<1x128xf32>
    %49 = vector.broadcast %48 : vector<1x128xf32> to vector<16x128xf32>
    %50 = vector.shape_cast %31 : vector<1x128xf32> to vector<1x128xf32>
    %51 = vector.broadcast %50 : vector<1x128xf32> to vector<16x128xf32>
    %52 = arith.select %47, %49, %51 : vector<16x128xi1>, vector<16x128xf32>
    %53 = vector.shape_cast %2 : vector<16x1xi1> to vector<16x1xi1>
    %54 = vector.broadcast %53 : vector<16x1xi1> to vector<16x128xi1>
    %55 = vector.shape_cast %38 : vector<1x128xf32> to vector<1x128xf32>
    %56 = vector.broadcast %55 : vector<1x128xf32> to vector<16x128xf32>
    %57 = vector.shape_cast %45 : vector<1x128xf32> to vector<1x128xf32>
    %58 = vector.broadcast %57 : vector<1x128xf32> to vector<16x128xf32>
    %59 = arith.select %54, %56, %58 : vector<16x128xi1>, vector<16x128xf32>
    %60 = arith.subf %15, %52 : vector<16x128xf32>
    %cst_15 = arith.constant 9.99999974E-6 : f32
    %61 = vector.broadcast %cst_15 : f32 to vector<16x128xf32>
    %62 = arith.addf %59, %61 : vector<16x128xf32>
    %63 = math.rsqrt %62 : vector<16x128xf32>
    %64 = arith.mulf %60, %63 : vector<16x128xf32>
    %c0_16 = arith.constant 0 : index
    %c0_17 = arith.constant 0 : index
    %65 = vector.load %arg2[%c0_16, %c0_17] : memref<1x128xf32, #tpu.memory_space<vmem>>, vector<1x128xf32>
    %66 = vector.broadcast %65 : vector<1x128xf32> to vector<16x128xf32>
    %67 = arith.mulf %64, %66 : vector<16x128xf32>
    %c0_18 = arith.constant 0 : index
    %c0_19 = arith.constant 0 : index
    %68 = vector.load %arg3[%c0_18, %c0_19] : memref<1x128xf32, #tpu.memory_space<vmem>>, vector<1x128xf32>
    %69 = vector.broadcast %68 : vector<1x128xf32> to vector<16x128xf32>
    %70 = arith.addf %67, %69 : vector<16x128xf32>
    %cst_20 = arith.constant 0.000000e+00 : f32
    %71 = vector.broadcast %cst_20 : f32 to vector<16x128xf32>
    %72 = arith.maximumf %70, %71 : vector<16x128xf32>
    %73 = vector.broadcast %12 : vector<16x1xf32> to vector<16x128xf32>
    %74 = arith.mulf %72, %73 : vector<16x128xf32>
    %c0_21 = arith.constant 0 : index
    %c0_22 = arith.constant 0 : index
    %75 = vector.load %arg4[%c0_21, %c0_22] : memref<128x128xf32, #tpu.memory_space<vmem>>, vector<128x128xf32>
    %cst_23 = arith.constant dense<0.000000e+00> : vector<16x128xf32>
    %76 = tpu.matmul %74, %75, %cst_23 {dimension_numbers = #tpu.dot_dimension_numbers<[1], [0], [0], [1], [0, 0, 1, 1], [], []>} : vector<16x128xf32>, vector<128x128xf32>, vector<16x128xf32> -> vector<16x128xf32>
    %cst_24 = arith.constant 0.000000e+00 : f32
    %77 = vector.shape_cast %2 : vector<16x1xi1> to vector<16x1xi1>
    %78 = vector.broadcast %77 : vector<16x1xi1> to vector<16x128xi1>
    %79 = vector.broadcast %cst_24 : f32 to vector<16x128xf32>
    %80 = arith.select %78, %76, %79 : vector<16x128xi1>, vector<16x128xf32>
    %cst_25 = arith.constant 0.000000e+00 : f32
    %81 = vector.shape_cast %2 : vector<16x1xi1> to vector<16x1xi1>
    %82 = vector.broadcast %81 : vector<16x1xi1> to vector<16x128xi1>
    %83 = vector.broadcast %cst_25 : f32 to vector<16x128xf32>
    %84 = arith.select %82, %83, %76 : vector<16x128xi1>, vector<16x128xf32>
    %cst_26 = arith.constant dense<0.000000e+00> : vector<128xf32>
    %85 = vector.multi_reduction <add>, %80, %cst_26 [0] : vector<16x128xf32> to vector<128xf32>
    %86 = vector.shape_cast %85 : vector<128xf32> to vector<1x128xf32>
    %cst_27 = arith.constant 1.250000e-01 : f32
    %87 = vector.broadcast %cst_27 : f32 to vector<1x128xf32>
    %88 = arith.mulf %86, %87 : vector<1x128xf32>
    %cst_28 = arith.constant dense<0.000000e+00> : vector<128xf32>
    %89 = vector.multi_reduction <add>, %84, %cst_28 [0] : vector<16x128xf32> to vector<128xf32>
    %90 = vector.shape_cast %89 : vector<128xf32> to vector<1x128xf32>
    %cst_29 = arith.constant 1.250000e-01 : f32
    %91 = vector.broadcast %cst_29 : f32 to vector<1x128xf32>
    %92 = arith.mulf %90, %91 : vector<1x128xf32>
    %93 = arith.mulf %80, %80 : vector<16x128xf32>
    %cst_30 = arith.constant dense<0.000000e+00> : vector<128xf32>
    %94 = vector.multi_reduction <add>, %93, %cst_30 [0] : vector<16x128xf32> to vector<128xf32>
    %95 = vector.shape_cast %94 : vector<128xf32> to vector<1x128xf32>
    %cst_31 = arith.constant 1.250000e-01 : f32
    %96 = vector.broadcast %cst_31 : f32 to vector<1x128xf32>
    %97 = arith.mulf %95, %96 : vector<1x128xf32>
    %98 = arith.mulf %88, %88 : vector<1x128xf32>
    %99 = arith.subf %97, %98 : vector<1x128xf32>
    %100 = arith.mulf %84, %84 : vector<16x128xf32>
    %cst_32 = arith.constant dense<0.000000e+00> : vector<128xf32>
    %101 = vector.multi_reduction <add>, %100, %cst_32 [0] : vector<16x128xf32> to vector<128xf32>
    %102 = vector.shape_cast %101 : vector<128xf32> to vector<1x128xf32>
    %cst_33 = arith.constant 1.250000e-01 : f32
    %103 = vector.broadcast %cst_33 : f32 to vector<1x128xf32>
    %104 = arith.mulf %102, %103 : vector<1x128xf32>
    %105 = arith.mulf %92, %92 : vector<1x128xf32>
    %106 = arith.subf %104, %105 : vector<1x128xf32>
    %107 = vector.shape_cast %2 : vector<16x1xi1> to vector<16x1xi1>
    %108 = vector.broadcast %107 : vector<16x1xi1> to vector<16x128xi1>
    %109 = vector.shape_cast %88 : vector<1x128xf32> to vector<1x128xf32>
    %110 = vector.broadcast %109 : vector<1x128xf32> to vector<16x128xf32>
    %111 = vector.shape_cast %92 : vector<1x128xf32> to vector<1x128xf32>
    %112 = vector.broadcast %111 : vector<1x128xf32> to vector<16x128xf32>
    %113 = arith.select %108, %110, %112 : vector<16x128xi1>, vector<16x128xf32>
    %114 = vector.shape_cast %2 : vector<16x1xi1> to vector<16x1xi1>
    %115 = vector.broadcast %114 : vector<16x1xi1> to vector<16x128xi1>
    %116 = vector.shape_cast %99 : vector<1x128xf32> to vector<1x128xf32>
    %117 = vector.broadcast %116 : vector<1x128xf32> to vector<16x128xf32>
    %118 = vector.shape_cast %106 : vector<1x128xf32> to vector<1x128xf32>
    %119 = vector.broadcast %118 : vector<1x128xf32> to vector<16x128xf32>
    %120 = arith.select %115, %117, %119 : vector<16x128xi1>, vector<16x128xf32>
    %121 = arith.subf %76, %113 : vector<16x128xf32>
    %cst_34 = arith.constant 9.99999974E-6 : f32
    %122 = vector.broadcast %cst_34 : f32 to vector<16x128xf32>
    %123 = arith.addf %120, %122 : vector<16x128xf32>
    %124 = math.rsqrt %123 : vector<16x128xf32>
    %125 = arith.mulf %121, %124 : vector<16x128xf32>
    %c0_35 = arith.constant 0 : index
    %c0_36 = arith.constant 0 : index
    %126 = vector.load %arg5[%c0_35, %c0_36] : memref<1x128xf32, #tpu.memory_space<vmem>>, vector<1x128xf32>
    %127 = vector.broadcast %126 : vector<1x128xf32> to vector<16x128xf32>
    %128 = arith.mulf %125, %127 : vector<16x128xf32>
    %129 = arith.mulf %128, %128 : vector<16x128xf32>
    %cst_37 = arith.constant dense<0.000000e+00> : vector<16xf32>
    %130 = vector.multi_reduction <add>, %129, %cst_37 [1] : vector<16x128xf32> to vector<16xf32>
    %131 = vector.shape_cast %130 : vector<16xf32> to vector<16x1xf32>
    %cst_38 = arith.constant 1.000000e-24 : f32
    %132 = vector.broadcast %cst_38 : f32 to vector<16x1xf32>
    %133 = arith.maximumf %131, %132 : vector<16x1xf32>
    %134 = math.rsqrt %133 : vector<16x1xf32>
    %135 = vector.broadcast %134 : vector<16x1xf32> to vector<16x128xf32>
    %136 = arith.mulf %128, %135 : vector<16x128xf32>
    %cst_39 = arith.constant dense<0.000000e+00> : vector<16x16xf32>
    %137 = tpu.matmul %136, %136, %cst_39 {dimension_numbers = #tpu.dot_dimension_numbers<[1], [1], [0], [0], [0, 0, 1, 0], [], []>} : vector<16x128xf32>, vector<16x128xf32>, vector<16x16xf32> -> vector<16x16xf32>
    %cst_40 = arith.constant 2.000000e+00 : f32
    %138 = vector.broadcast %cst_40 : f32 to vector<16x16xf32>
    %139 = arith.mulf %137, %138 : vector<16x16xf32>
    %140 = tpu.iota {dimensions = array<i32: 0>} : vector<16x16xi32>
    %141 = tpu.iota {dimensions = array<i32: 1>} : vector<16x16xi32>
    %c8_i32_41 = arith.constant 8 : i32
    %142 = vector.broadcast %c8_i32_41 : i32 to vector<16x16xi32>
    %143 = arith.cmpi slt, %141, %142 : vector<16x16xi32>
    %c8_i32_42 = arith.constant 8 : i32
    %144 = vector.broadcast %c8_i32_42 : i32 to vector<16x16xi32>
    %145 = arith.cmpi sge, %141, %144 : vector<16x16xi32>
    %c16_i32_43 = arith.constant 16 : i32
    %146 = vector.broadcast %c16_i32_43 : i32 to vector<16x16xi32>
    %147 = arith.cmpi slt, %141, %146 : vector<16x16xi32>
    %148 = arith.andi %145, %147 : vector<16x16xi1>
    %149 = arith.ori %143, %148 : vector<16x16xi1>
    %150 = arith.cmpi ne, %140, %141 : vector<16x16xi32>
    %151 = arith.andi %149, %150 : vector<16x16xi1>
    %cst_44 = arith.constant -1.000000e+30 : f32
    %152 = vector.broadcast %cst_44 : f32 to vector<16x16xf32>
    %153 = arith.select %151, %139, %152 : vector<16x16xi1>, vector<16x16xf32>
    %cst_45 = arith.constant dense<0xFF800000> : vector<16xf32>
    %154 = vector.multi_reduction <maximumf>, %153, %cst_45 [1] : vector<16x16xf32> to vector<16xf32>
    %155 = vector.shape_cast %154 : vector<16xf32> to vector<16x1xf32>
    %156 = vector.broadcast %155 : vector<16x1xf32> to vector<16x16xf32>
    %157 = arith.subf %153, %156 : vector<16x16xf32>
    %158 = math.exp %157 : vector<16x16xf32>
    %cst_46 = arith.constant dense<0.000000e+00> : vector<16xf32>
    %159 = vector.multi_reduction <add>, %158, %cst_46 [1] : vector<16x16xf32> to vector<16xf32>
    %160 = vector.shape_cast %159 : vector<16xf32> to vector<16x1xf32>
    %161 = math.log %160 : vector<16x1xf32>
    %162 = arith.addf %155, %161 : vector<16x1xf32>
    %163 = vector.extract_strided_slice %136 {offsets = [0, 0], sizes = [8, 128], strides = [1, 1]} : vector<16x128xf32> to vector<8x128xf32>
    %164 = vector.extract_strided_slice %136 {offsets = [8, 0], sizes = [8, 128], strides = [1, 1]} : vector<16x128xf32> to vector<8x128xf32>
    %165 = arith.mulf %163, %164 : vector<8x128xf32>
    %cst_47 = arith.constant dense<0.000000e+00> : vector<8xf32>
    %166 = vector.multi_reduction <add>, %165, %cst_47 [1] : vector<8x128xf32> to vector<8xf32>
    %167 = vector.shape_cast %166 : vector<8xf32> to vector<8x1xf32>
    %cst_48 = arith.constant 2.000000e+00 : f32
    %168 = vector.broadcast %cst_48 : f32 to vector<8x1xf32>
    %169 = arith.mulf %167, %168 : vector<8x1xf32>
    %170 = tpu.iota {dimensions = array<i32: 0>} : vector<8x1xi32>
    %c8_i32_49 = arith.constant 8 : i32
    %171 = vector.broadcast %c8_i32_49 : i32 to vector<8x1xi32>
    %172 = arith.cmpi slt, %170, %171 : vector<8x1xi32>
    %173 = arith.extui %172 : vector<8x1xi1> to vector<8x1xi32>
    %174 = arith.sitofp %173 : vector<8x1xi32> to vector<8x1xf32>
    %175 = arith.mulf %162, %12 : vector<16x1xf32>
    %cst_50 = arith.constant dense<0.000000e+00> : vector<1xf32>
    %176 = vector.multi_reduction <add>, %175, %cst_50 [0] : vector<16x1xf32> to vector<1xf32>
    %177 = vector.shape_cast %176 : vector<1xf32> to vector<1x1xf32>
    %178 = arith.mulf %169, %174 : vector<8x1xf32>
    %cst_51 = arith.constant dense<0.000000e+00> : vector<1xf32>
    %179 = vector.multi_reduction <add>, %178, %cst_51 [0] : vector<8x1xf32> to vector<1xf32>
    %180 = vector.shape_cast %179 : vector<1xf32> to vector<1x1xf32>
    %cst_52 = arith.constant 2.000000e+00 : f32
    %181 = vector.broadcast %cst_52 : f32 to vector<1x1xf32>
    %182 = arith.mulf %181, %180 : vector<1x1xf32>
    %183 = arith.subf %177, %182 : vector<1x1xf32>
    %cst_53 = arith.constant 1.250000e-01 : f32
    %184 = vector.broadcast %cst_53 : f32 to vector<1x1xf32>
    %185 = arith.mulf %183, %184 : vector<1x1xf32>
    %c0_54 = arith.constant 0 : index
    %c0_55 = arith.constant 0 : index
    %186 = vector.load %arg6[%c0_54, %c0_55] : memref<1x1xf32, #tpu.memory_space<vmem>>, vector<1x1xf32>
    tpu.vector_store %arg6[%c0_54, %c0_55], %185 {strides = array<i32>} : memref<1x1xf32, #tpu.memory_space<vmem>>, vector<1x1xf32>,
    return
  }
}

</mosaic_0001>

<bundles_post_ra>
// kernel: tpu_custom_call.1
= control target key start
LH: loop header
LB: loop body
LE: loop exit
PB: predicated region body
PF: predicated region fallthrough
CT: control target
= control target key end

     0   :  { %11 = vsyncpa [#allocation3], 0  ;;  %s742_s0 = inlined_call_operand.hbm [shape: f32[16,256], index: 0, kind: input, shape index: {}]   ;;  %s743_s1 = inlined_call_operand.hbm [shape: f32[256,128], index: 1, kind: input, shape index: {}]   ;;  %s744_s2 = inlined_call_operand.vmem [shape: f32[1,128], index: 2, kind: input, shape index: {}]   ;;  %s745_s3 = inlined_call_operand.vmem [shape: f32[1,128], index: 3, kind: input, shape index: {}]   ;;  %s746_s4 = inlined_call_operand.hbm [shape: f32[128,128], index: 4, kind: input, shape index: {}]   ;;  %s747_s5 = inlined_call_operand.vmem [shape: f32[1,128], index: 5, kind: input, shape index: {}]   ;;  %s748_s6 = inlined_call_operand.hbm [shape: f32[1,1], index: 6, kind: output, shape index: {}]  }
   0x1   :  { %12 = vsyncpa [#allocation6], 0  ;;  %s31_s23 = sshll.u32 %s743_s1, 4  ;;  %s32_s23 = int_to_ptr.hbm [resolvable:$true] %s31_s23 }
   0x2   :  { %13 = vsyncpa [#allocation4], 0  ;;  %s653_s24 = smov [#allocation5]   ;;  %s18_s28 = sshll.u32 %s742_s0, 4  ;;  %s19_s28 = int_to_ptr.hbm [resolvable:$true] %s18_s28 }
   0x3   :  { %s33_s25 = sshll.u32 %s653_s24, 4  ;;  %s654_s29 = smov 128   ;;  %s34_s25 = int_to_ptr.vmem [resolvable:$true] %s33_s25 }
   0x4   :  { %s655_s30 = smov 8   ;;  %s656_s7 = smov [#allocation2]  }
   0x5   :  { %39 = dma.hbm_to_vmem [thread:$0]  %s32_s23, 4096, %s34_s25, [#allocation6], %s654_s29, %s654_s29, %s655_s30  }
   0x6   :  { %s20_s8 = sshll.u32 %s656_s7, 4  ;;  %s657_s9 = smov 256   ;;  %s21_s8 = int_to_ptr.vmem [resolvable:$true] %s20_s8 }
   0x7   :  { %s658_s10 = smov 16   ;;  %s48_s12 = sshll.u32 %s746_s4, 4  ;;  %s49_s12 = int_to_ptr.hbm [resolvable:$true] %s48_s12 }
   0x8   :  { %26 = dma.hbm_to_vmem [thread:$0]  %s19_s28, 512, %s21_s8, [#allocation3], %s657_s9, %s657_s9, %s658_s10  }
   0x9   :  { %s659_s13 = smov [#allocation7]  }
   0xa   :  { %s50_s14 = sshll.u32 %s659_s13, 4  ;;  %s51_s14 = int_to_ptr.vmem [resolvable:$true] %s50_s14 }
   0xb   :  { %56 = dma.hbm_to_vmem [thread:$0]  %s49_s12, 2048, %s51_s14, [#allocation6], %s654_s29, %s654_s29, %s655_s30  }
   0xc   :  { %647 = dma.done.wait [#allocation3], 512  }
   0xd   :  { %648 = vsyncadd [#allocation3], 4294966784 }
   0xe   :  { %649 = dma.done.wait [#allocation6], 6144  }
   0xf   :  { %650 = vsyncadd [#allocation6], 4294961152  ;;  %v107_v0 = vld [vmem:[#allocation5 + $0x78] sm:$0xff]  ;;  %v106_v2 = vld [vmem:[#allocation5 + $0x70] sm:$0xff]  ;;  %s509_s20 = sshll.u32 %s748_s6, 4  ;;  %s510_s20 = int_to_ptr.hbm [resolvable:$true] %s509_s20 }
  0x10   :  { %v123_v1 = vld [vmem:[#allocation5 + $0xf8] sm:$0xff]  ;;  %124 = vmatpush.msra.mxu0 %v107_v0  ;;  %v122_v3 = vld [vmem:[#allocation5 + $0xf0] sm:$0xff]  ;;  %v105_v4 = vld [vmem:[#allocation5 + $0x68] sm:$0xff] }
  0x11   :  { %147 = vmatpush.msra.mxu1 %v123_v1  ;;  %v121_v5 = vld [vmem:[#allocation5 + $0xe8] sm:$0xff]  ;;  %v104_v6 = vld [vmem:[#allocation5 + $0x60] sm:$0xff]  ;;  %v103_v8 = vld [vmem:[#allocation5 + $0x58] sm:$0xff] }
  0x12   :  { %125 = vmatpush.msra.mxu0 %v106_v2  ;;  %v120_v7 = vld [vmem:[#allocation5 + $0xe0] sm:$0xff]  ;;  %v119_v9 = vld [vmem:[#allocation5 + $0xd8] sm:$0xff]  ;;  %v102_v10 = vld [vmem:[#allocation5 + $0x50] sm:$0xff] }
  0x13   :  { %148 = vmatpush.msra.mxu1 %v122_v3  ;;  %v118_v11 = vld [vmem:[#allocation5 + $0xd0] sm:$0xff]  ;;  %v101_v12 = vld [vmem:[#allocation5 + $0x48] sm:$0xff]  ;;  %v100_v14 = vld [vmem:[#allocation5 + $0x40] sm:$0xff] }
  0x14   :  { %126 = vmatpush.msra.mxu0 %v105_v4  ;;  %v117_v13 = vld [vmem:[#allocation5 + $0xc8] sm:$0xff]  ;;  %v116_v15 = vld [vmem:[#allocation5 + $0xc0] sm:$0xff]  ;;  %v99_v16 = vld [vmem:[#allocation5 + $0x38] sm:$0xff] }
  0x15   :  { %149 = vmatpush.msra.mxu1 %v121_v5  ;;  %v115_v17 = vld [vmem:[#allocation5 + $0xb8] sm:$0xff]  ;;  %v98_v18 = vld [vmem:[#allocation5 + $0x30] sm:$0xff]  ;;  %v97_v20 = vld [vmem:[#allocation5 + $0x28] sm:$0xff] }
  0x16   :  { %127 = vmatpush.msra.mxu0 %v104_v6  ;;  %v114_v19 = vld [vmem:[#allocation5 + $0xb0] sm:$0xff]  ;;  %v113_v21 = vld [vmem:[#allocation5 + $0xa8] sm:$0xff]  ;;  %v96_v22 = vld [vmem:[#allocation5 + $0x20] sm:$0xff] }
  0x17   :  { %150 = vmatpush.msra.mxu1 %v120_v7  ;;  %v112_v23 = vld [vmem:[#allocation5 + $0xa0] sm:$0xff]  ;;  %v95_v24 = vld [vmem:[#allocation5 + $0x18] sm:$0xff]  ;;  %v94_v26 = vld [vmem:[#allocation5 + $0x10] sm:$0xff] }
  0x18   :  { %128 = vmatpush.msra.mxu0 %v103_v8  ;;  %v111_v25 = vld [vmem:[#allocation5 + $0x98] sm:$0xff]  ;;  %v110_v27 = vld [vmem:[#allocation5 + $0x90] sm:$0xff]  ;;  %v93_v28 = vld [vmem:[#allocation5 + $0x8] sm:$0xff] }
  0x19   :  { %151 = vmatpush.msra.mxu1 %v119_v9  ;;  %v109_v29 = vld [vmem:[#allocation5 + $0x88] sm:$0xff]  ;;  %v92_v30 = vld [vmem:[#allocation5] sm:$0xff]  ;;  %v90_v34 = vld [vmem:[#allocation2 + $0x10] sm:$0xff] }
  0x1a   :  { %129 = vmatpush.msra.mxu0 %v102_v10  ;;  %v108_v31 = vld [vmem:[#allocation5 + $0x80] sm:$0xff]  ;;  %v89_v33 = vld [vmem:[#allocation2 + $0x8] sm:$0xff]  ;;  %v91_v35 = vld [vmem:[#allocation2 + $0x18] sm:$0xff] }
  0x1b   :  { %152 = vmatpush.msra.mxu1 %v118_v11  ;;  %v88_v32 = vld [vmem:[#allocation2] sm:$0xff]  ;;  %v279_v36 = vld [vmem:[#allocation7 + $0x78] sm:$0xff]  ;;  %v278_v37 = vld [vmem:[#allocation7 + $0x70] sm:$0xff] }
  0x1c   :  { %130 = vmatpush.msra.mxu0 %v101_v12  ;;  %280 = vmatpush.msra.mxu2 %v279_v36  ;;  %v277_v38 = vld [vmem:[#allocation7 + $0x68] sm:$0xff]  ;;  %v276_v39 = vld [vmem:[#allocation7 + $0x60] sm:$0xff]  ;;  %v275_v40 = vld [vmem:[#allocation7 + $0x58] sm:$0xff] }
  0x1d   :  { %153 = vmatpush.msra.mxu1 %v117_v13  ;;  %v274_v41 = vld [vmem:[#allocation7 + $0x50] sm:$0xff]  ;;  %v273_v42 = vld [vmem:[#allocation7 + $0x48] sm:$0xff]  ;;  %v272_v43 = vld [vmem:[#allocation7 + $0x40] sm:$0xff] }
  0x1e   :  { %131 = vmatpush.msra.mxu0 %v100_v14  ;;  %281 = vmatpush.msra.mxu2 %v278_v37  ;;  %v271_v44 = vld [vmem:[#allocation7 + $0x38] sm:$0xff]  ;;  %v270_v48 = vld [vmem:[#allocation7 + $0x30] sm:$0xff]  ;;  %v269_v51 = vld [vmem:[#allocation7 + $0x28] sm:$0xff] }
  0x1f   :  { %154 = vmatpush.msra.mxu1 %v116_v15  ;;  %v268_v54 = vld [vmem:[#allocation7 + $0x20] sm:$0xff]  ;;  %v267_v57 = vld [vmem:[#allocation7 + $0x18] sm:$0xff]  ;;  %v266_v63 = vld [vmem:[#allocation7 + $0x10] sm:$0xff] }
  0x20   :  { %132 = vmatpush.msra.mxu0 %v99_v16  ;;  %282 = vmatpush.msra.mxu2 %v277_v38  ;;  %v265_v3 = vld [vmem:[#allocation7 + $0x8] sm:$0xff]  ;;  %v264_v8 = vld [vmem:[#allocation7] sm:$0xff] }
  0x21   :  { %155 = vmatpush.msra.mxu1 %v115_v17 }
  0x22   :  { %133 = vmatpush.msra.mxu0 %v98_v18  ;;  %283 = vmatpush.msra.mxu2 %v276_v39  ;;  %v528_v39 = vld [vmem:[%s744_s2] ss:$0 sm:$0xff] }
  0x23   :  { %156 = vmatpush.msra.mxu1 %v114_v19 }
  0x24   :  { %134 = vmatpush.msra.mxu0 %v97_v20  ;;  %284 = vmatpush.msra.mxu2 %v275_v40 }
  0x25   :  { %157 = vmatpush.msra.mxu1 %v113_v21 }
  0x26   :  { %135 = vmatpush.msra.mxu0 %v96_v22  ;;  %285 = vmatpush.msra.mxu2 %v274_v41 }
  0x27   :  { %158 = vmatpush.msra.mxu1 %v112_v23 }
  0x28   :  { %136 = vmatpush.msra.mxu0 %v95_v24  ;;  %286 = vmatpush.msra.mxu2 %v273_v42 }
  0x29   :  { %159 = vmatpush.msra.mxu1 %v111_v25 }
  0x2a   :  { %137 = vmatpush.msra.mxu0 %v94_v26  ;;  %287 = vmatpush.msra.mxu2 %v272_v43  ;;  %v529_v43 = vld [vmem:[%s745_s3] ss:$0 sm:$0xff] }
  0x2b   :  { %160 = vmatpush.msra.mxu1 %v110_v27 }
  0x2c   :  { %138 = vmatpush.msra.mxu0 %v93_v28  ;;  %288 = vmatpush.msra.mxu2 %v271_v44 }
  0x2d   :  { %161 = vmatpush.msra.mxu1 %v109_v29 }
  0x2e   :  { %139 = vmatpush.msra.mxu0 %v92_v30  ;;  %289 = vmatpush.msra.mxu2 %v270_v48 }
  0x2f   :  { %162 = vmatpush.msra.mxu1 %v108_v31  ;;  %140 = vmatmul.f32.vlgmr.msra.gmra.mxu0 %v88_v32 }
  0x30   :  { %163 = vmatmul.f32.vlgmr.msra.gmra.mxu1 %v89_v33  ;;  %290 = vmatpush.msra.mxu2 %v269_v51 }
  0x32   :  { %291 = vmatpush.msra.mxu2 %v268_v54 }
  0x34   :  { %292 = vmatpush.msra.mxu2 %v267_v57 }
  0x36   :  { %293 = vmatpush.msra.mxu2 %v266_v63 }
  0x37   :  { %143 = vmatmul.f32.gmra.mxu0 %v90_v34 }
  0x38   :  { %166 = vmatmul.f32.gmra.mxu1 %v91_v35  ;;  %294 = vmatpush.msra.mxu2 %v265_v3 }
  0x3a   :  { %295 = vmatpush.msra.mxu2 %v264_v8 }
  0xac   :  { %v141_v45 = vpop.f32.mrf.mxu0 }
  0xad   :  { %v164_v46 = vpop.f32.mrf.mxu1 }
  0xae   :  { %v705_v47 = vadd.f32 %v164_v46, %v141_v45 }
  0xb0   :  { %v179_v49 = vrot.slane %v705_v47, 4  ;;  %v194_v50 = vmul.f32 %v705_v47, %v705_v47 }
  0xb2   :  { %v180_v52 = vadd.f32 %v179_v49, %v705_v47  ;;  %v197_v53 = vrot.slane %v194_v50, 4 }
  0xb4   :  { %v181_v55 = vrot.slane %v180_v52, 2  ;;  %v198_v56 = vadd.f32 %v197_v53, %v194_v50  ;;  %v144_v58 = vpop.f32.mrf.mxu0 }
  0xb5   :  { %v167_v59 = vpop.f32.mrf.mxu1 }
  0xb6   :  { %v182_v60 = vadd.f32 %v181_v55, %v180_v52  ;;  %v199_v61 = vrot.slane %v198_v56, 2  ;;  %v711_v62 = vadd.f32 %v167_v59, %v144_v58 }
  0xb8   :  { %v200_v0 = vadd.f32 %v199_v61, %v198_v56  ;;  %v187_v1 = vrot.slane %v711_v62, 4  ;;  %v207_v2 = vmul.f32 %v711_v62, %v711_v62  ;;  %v183_v4 = vrot.slane %v182_v60, 1 }
  0xba   :  { %v201_v5 = vrot.slane %v200_v0, 1  ;;  %v188_v6 = vadd.f32 %v187_v1, %v711_v62  ;;  %v209_v7 = vrot.slane %v207_v2, 4  ;;  %v184_v9 = vadd.f32 %v183_v4, %v182_v60 }
  0xbc   :  { %v202_v10 = vadd.f32 %v201_v5, %v200_v0  ;;  %v189_v11 = vrot.slane %v188_v6, 2  ;;  %v210_v12 = vadd.f32 %v209_v7, %v207_v2  ;;  %v185_v13 = vmul.f32 0.125, %v184_v9 }
  0xbe   :  { %v203_v14 = vmul.f32 0.125, %v202_v10  ;;  %v190_v15 = vadd.f32 %v189_v11, %v188_v6  ;;  %v211_v16 = vrot.slane %v210_v12, 2  ;;  %v204_v17 = vmul.f32 %v185_v13, %v185_v13 }
  0xbf   :  { %v222_v38 = vsub.f32 %v705_v47, %v185_v13 }
  0xc0   :  { %v212_v18 = vadd.f32 %v211_v16, %v210_v12  ;;  %v205_v19 = vsub.f32 %v203_v14, %v204_v17  ;;  %v191_v20 = vrot.slane %v190_v15, 1 }
  0xc2   :  { %v213_v21 = vrot.slane %v212_v18, 1  ;;  %v224_v22 = vadd.f32 1e-05, %v205_v19  ;;  %v192_v23 = vadd.f32 %v191_v20, %v190_v15 }
  0xc4   :  { %v214_v24 = vadd.f32 %v213_v21, %v212_v18  ;;  %531 = vrsqrt.f32 %v224_v22  ;;  %v193_v25 = vmul.f32 0.125, %v192_v23  ;;  %vm232_vm1 = vweird.f32 %v224_v22 }
  0xc6   :  { %v215_v26 = vmul.f32 0.125, %v214_v24  ;;  %v216_v27 = vmul.f32 %v193_v25, %v193_v25  ;;  %v223_v50 = vsub.f32 %v711_v62, %v193_v25 }
  0xc8   :  { %v217_v28 = vsub.f32 %v215_v26, %v216_v27 }
  0xca   :  { %v532_v29 = vpop.eup %531  ;;  %v225_v30 = vadd.f32 1e-05, %v217_v28 }
  0xcb   :  { %v227_v31 = vmul.f32 %v532_v29, %v224_v22  ;;  %vm233_vm0 = vweird.f32 %v532_v29 }
  0xcc   :  { %533 = vrsqrt.f32 %v225_v30  ;;  %vm234_vm2 = vmor %vm232_vm1, %vm233_vm0  ;;  %vm242_vm4 = vweird.f32 %v225_v30 }
  0xcd   :  { %v228_v32 = vmul.f32 %v532_v29, %v227_v31 }
  0xcf   :  { %v229_v33 = vmul.f32 0.5, %v228_v32 }
  0xd1   :  { %v230_v34 = vsub.f32 1.5, %v229_v33 }
  0xd2   :  { %v534_v35 = vpop.eup %533 }
  0xd3   :  { %v231_v36 = vmul.f32 %v532_v29, %v230_v34  ;;  %v237_v37 = vmul.f32 %v534_v35, %v225_v30  ;;  %vm243_vm3 = vweird.f32 %v534_v35 }
  0xd4   :  { %vm244_vm5 = vmor %vm242_vm4, %vm243_vm3 }
  0xd5   :  { %v235_v40 = vsel %vm234_vm2, %v532_v29, %v231_v36  ;;  %v238_v41 = vmul.f32 %v534_v35, %v237_v37 }
  0xd6   :  { %v246_v42 = vmul.f32 %v235_v40, %v222_v38 }
  0xd7   :  { %v239_v44 = vmul.f32 0.5, %v238_v41 }
  0xd8   :  { %v252_v45 = vmul.f32 %v528_v39, %v246_v42 }
  0xd9   :  { %v240_v46 = vsub.f32 1.5, %v239_v44 }
  0xda   :  { %v258_v48 = vadd.f32 %v529_v43, %v252_v45  ;;  %v530_v45 = vld [vmem:[%s747_s5] ss:$0 sm:$0xff]  ;;  %s660_s5 = smov [#allocation8]  }
  0xdb   :  { %v241_v49 = vmul.f32 %v534_v35, %v240_v46  ;;  %s507_s17 = sshll.u32 %s660_s5, 4  ;;  %s508_s17 = int_to_ptr.vmem [resolvable:$true] %s507_s17 }
  0xdc   :  { %v260_v47 = vmax.f32 %v258_v48, 0.0 }
  0xdd   :  { %v245_v51 = vsel %vm244_vm5, %v534_v35, %v241_v49 }
  0xde   :  { %296 = vmatmul.f32.vlgmr.msra.gmra.mxu2 %v260_v47  ;;  %v247_v52 = vmul.f32 %v245_v51, %v223_v50 }
  0xe0   :  { %v253_v53 = vmul.f32 %v528_v39, %v247_v52 }
  0xe2   :  { %v259_v54 = vadd.f32 %v529_v43, %v253_v53 }
  0xe4   :  { %v261_v55 = vmax.f32 %v259_v54, 0.0 }
  0xe6   :  { %299 = vmatmul.f32.gmra.mxu2 %v261_v55 }
 0x161   :  { %v725_v56 = vpop.f32.mrf.mxu2 }
 0x162   :  { %v308_v57 = vrot.slane %v725_v56, 4  ;;  %v323_v58 = vmul.f32 %v725_v56, %v725_v56 }
 0x164   :  { %v309_v59 = vadd.f32 %v308_v57, %v725_v56  ;;  %v326_v60 = vrot.slane %v323_v58, 4 }
 0x166   :  { %v310_v61 = vrot.slane %v309_v59, 2  ;;  %v327_v62 = vadd.f32 %v326_v60, %v323_v58 }
 0x168   :  { %v311_v63 = vadd.f32 %v310_v61, %v309_v59  ;;  %v328_v0 = vrot.slane %v327_v62, 2 }
 0x169   :  { %v300_v1 = vpop.f32.mrf.mxu2 }
 0x16a   :  { %v312_v2 = vrot.slane %v311_v63, 1  ;;  %v329_v3 = vadd.f32 %v328_v0, %v327_v62  ;;  %v316_v4 = vrot.slane %v300_v1, 4  ;;  %v336_v5 = vmul.f32 %v300_v1, %v300_v1 }
 0x16c   :  { %v313_v6 = vadd.f32 %v312_v2, %v311_v63  ;;  %v330_v7 = vrot.slane %v329_v3, 1  ;;  %v317_v8 = vadd.f32 %v316_v4, %v300_v1  ;;  %v338_v9 = vrot.slane %v336_v5, 4 }
 0x16e   :  { %v314_v10 = vmul.f32 0.125, %v313_v6  ;;  %v331_v11 = vadd.f32 %v330_v7, %v329_v3  ;;  %v318_v12 = vrot.slane %v317_v8, 2  ;;  %v339_v13 = vadd.f32 %v338_v9, %v336_v5 }
 0x170   :  { %v332_v14 = vmul.f32 0.125, %v331_v11  ;;  %v333_v15 = vmul.f32 %v314_v10, %v314_v10  ;;  %v319_v16 = vadd.f32 %v318_v12, %v317_v8  ;;  %v340_v17 = vrot.slane %v339_v13, 2 }
 0x171   :  { %v351_v48 = vsub.f32 %v725_v56, %v314_v10  ;;  %v71_v10 = vlaneseq }
 0x172   :  { %v334_v18 = vsub.f32 %v332_v14, %v333_v15  ;;  %v320_v19 = vrot.slane %v319_v16, 1  ;;  %v341_v20 = vadd.f32 %v340_v17, %v339_v13 }
 0x173   :  { %v439_v11 = vand.u32 127, %v71_v10  ;;  %v72_v12 = vshrl.u32 %v71_v10, 7 }
 0x174   :  { %v353_v21 = vadd.f32 1e-05, %v334_v18  ;;  %v321_v22 = vadd.f32 %v320_v19, %v319_v16  ;;  %v342_v23 = vrot.slane %v341_v20, 1 }
 0x175   :  { %vm441_vm2 = vcmp.ge.s32.totalorder %v439_v11, 8  ;;  %vm442_vm3 = vcmp.lt.s32.totalorder %v439_v11, 16  ;;  %vm440_vm4 = vcmp.lt.s32.totalorder %v439_v11, 8  ;;  %v73_v15 = vadd.s32 8, %v72_v12 }
 0x176   :  { %535 = vrsqrt.f32 %v353_v21  ;;  %v322_v24 = vmul.f32 0.125, %v321_v22  ;;  %v343_v25 = vadd.f32 %v342_v23, %v341_v20  ;;  %vm361_vm10 = vweird.f32 %v353_v21  ;;  %vm443_vm5 = vmand %vm441_vm2, %vm442_vm3 }
 0x178   :  { %v345_v26 = vmul.f32 %v322_v24, %v322_v24  ;;  %v344_v27 = vmul.f32 0.125, %v343_v25  ;;  %v352_v42 = vsub.f32 %v300_v1, %v322_v24 }
 0x17a   :  { %v346_v28 = vsub.f32 %v344_v27, %v345_v26 }
 0x17c   :  { %v536_v29 = vpop.eup %535  ;;  %v354_v30 = vadd.f32 1e-05, %v346_v28 }
 0x17d   :  { %v356_v31 = vmul.f32 %v536_v29, %v353_v21  ;;  %vm362_vm8 = vweird.f32 %v536_v29 }
 0x17e   :  { %537 = vrsqrt.f32 %v354_v30  ;;  %vm371_vm7 = vweird.f32 %v354_v30  ;;  %vm363_vm11 = vmor %vm361_vm10, %vm362_vm8  ;;  %vm446_vm10 = vcmp.ne.s32.totalorder %v73_v15, %v439_v11 }
 0x17f   :  { %v357_v32 = vmul.f32 %v536_v29, %v356_v31 }
 0x181   :  { %v358_v35 = vmul.f32 0.5, %v357_v32 }
 0x183   :  { %v359_v38 = vsub.f32 1.5, %v358_v35 }
 0x184   :  { %v538_v33 = vpop.eup %537 }
 0x185   :  { %v366_v34 = vmul.f32 %v538_v33, %v354_v30  ;;  %vm372_vm6 = vweird.f32 %v538_v33  ;;  %v360_v41 = vmul.f32 %v536_v29, %v359_v38 }
 0x186   :  { %vm373_vm9 = vmor %vm371_vm7, %vm372_vm6  ;;  %vm445_vm7 = vcmp.ne.s32.totalorder %v72_v12, %v439_v11 }
 0x187   :  { %v367_v36 = vmul.f32 %v538_v33, %v366_v34  ;;  %v364_v46 = vsel %vm363_vm11, %v536_v29, %v360_v41  ;;  %vm444_vm6 = vmor %vm440_vm4, %vm443_vm5 }
 0x188   :  { %v375_v50 = vmul.f32 %v364_v46, %v351_v48  ;;  %vm447_vm8 = vmand %vm444_vm6, %vm445_vm7 }
 0x189   :  { %v368_v37 = vmul.f32 0.5, %v367_v36  ;;  %vm448_vm11 = vmand %vm444_vm6, %vm446_vm10 }
 0x18a   :  { %v381_v51 = vmul.f32 %v530_v45, %v375_v50 }
 0x18b   :  { %v369_v39 = vsub.f32 1.5, %v368_v37 }
 0x18c   :  { %v383_v52 = vmul.f32 %v381_v51, %v381_v51 }
 0x18d   :  { %v370_v40 = vmul.f32 %v538_v33, %v369_v39 }
 0x18f   :  { %v374_v43 = vsel %vm373_vm9, %v538_v33, %v370_v40  ;;  %vm451_vm9 = vcmask 130048  }
 0x190   :  { %v376_v44 = vmul.f32 %v374_v43, %v352_v42 }
 0x192   :  { %v382_v49 = vmul.f32 %v530_v45, %v376_v44 }
 0x194   :  { %v384_v47 = vmul.f32 %v382_v49, %v382_v49 }
 0x196   :  { %387 = vadd.xlane.f32.xlu0 %v384_v47 }
 0x19e   :  { %385 = vadd.xlane.f32.xlu0 %v383_v52 }
 0x209   :  { %v388_v53 = vpop.xlane.xlu0 %387 }
 0x20a   :  { %v390_v54 = vmax.f32 %v388_v53, 1e-24 }
 0x20c   :  { %539 = vrsqrt.f32 %v390_v54  ;;  %vm407_vm13 = vweird.f32 %v390_v54 }
 0x211   :  { %v386_v55 = vpop.xlane.xlu0 %385 }
 0x212   :  { %v540_v57 = vpop.eup %539  ;;  %v389_v58 = vmax.f32 %v386_v55, 1e-24 }
 0x213   :  { %v402_v59 = vmul.f32 %v540_v57, %v390_v54  ;;  %vm408_vm12 = vweird.f32 %v540_v57 }
 0x214   :  { %541 = vrsqrt.f32 %v389_v58  ;;  %vm409_vm14 = vmor %vm407_vm13, %vm408_vm12  ;;  %vm397_vm0 = vweird.f32 %v389_v58  ;;  %vm500_vm12 = vcmask 0  }
 0x215   :  { %v403_v60 = vmul.f32 %v540_v57, %v402_v59 }
 0x217   :  { %v404_v61 = vmul.f32 0.5, %v403_v60 }
 0x219   :  { %v405_v62 = vsub.f32 1.5, %v404_v61 }
 0x21a   :  { %v542_v56 = vpop.eup %541 }
 0x21b   :  { %v392_v63 = vmul.f32 %v542_v56, %v389_v58  ;;  %v406_v0 = vmul.f32 %v540_v57, %v405_v62  ;;  %vm398_vm15 = vweird.f32 %v542_v56 }
 0x21c   :  { %vm399_vm1 = vmor %vm397_vm0, %vm398_vm15 }
 0x21d   :  { %v393_v1 = vmul.f32 %v542_v56, %v392_v63  ;;  %v410_v2 = vsel %vm409_vm14, %v540_v57, %v406_v0 }
 0x21e   :  { %v412_v3 = vmul.f32 %v410_v2, %v382_v49 }
 0x21f   :  { %v394_v4 = vmul.f32 0.5, %v393_v1 }
 0x220   :  { %427 = vmatpush.xpose.msra.mxu3 %v412_v3 }
 0x221   :  { %v395_v5 = vsub.f32 1.5, %v394_v4 }
 0x223   :  { %v396_v6 = vmul.f32 %v542_v56, %v395_v5 }
 0x225   :  { %v400_v7 = vsel %vm399_vm1, %v542_v56, %v396_v6 }
 0x226   :  { %v411_v8 = vmul.f32 %v400_v7, %v381_v51 }
 0x228   :  { %428 = vmatpush.xpose.msra.mxu3 %v411_v8  ;;  %v476_v9 = vmul.f32 %v412_v3, %v411_v8 }
 0x22a   :  { %477 = vadd.xlane.f32.xlu0 %v476_v9 }
 0x22b   :  { %429 = vmatmul.f32.vlgmr.msra.gmra.mxu3 %v411_v8 }
 0x233   :  { %432 = vmatmul.f32.gmra.mxu3 %v412_v3 }
 0x29d   :  { %v478_v33 = vpop.xlane.xlu0 %477 }
 0x29e   :  { %v479_v34 = vmul.f32 2.0, %v478_v33 }
 0x2a0   :  { %v491_v35 = vrot.slane %v479_v34, 4 }
 0x2a2   :  { %v492_v38 = vadd.f32 %v491_v35, %v479_v34 }
 0x2a4   :  { %v493_v41 = vrot.slane %v492_v38, 2 }
 0x2a6   :  { %v494_v45 = vadd.f32 %v493_v41, %v492_v38 }
 0x2a8   :  { %v495_v49 = vrot.slane %v494_v45, 1 }
 0x2aa   :  { %v496_v51 = vadd.f32 %v495_v49, %v494_v45 }
 0x2ac   :  { %v497_v54 = vmul.f32 2.0, %v496_v51 }
 0x2ae   :  { %v430_v13 = vpop.f32.mrf.mxu3 }
 0x2af   :  { %v436_v14 = vmul.f32 2.0, %v430_v13 }
 0x2b1   :  { %v449_v16 = vsel %vm447_vm8, %v436_v14, -1e+30 }
 0x2b2   :  { %v452_v17 = vsel %vm451_vm9, %v449_v16, -inf }
 0x2b3   :  { %453 = vmax.xlane.f32.xlu1 %v452_v17 }
 0x2b6   :  { %v433_v18 = vpop.f32.mrf.mxu3 }
 0x2b7   :  { %v437_v19 = vmul.f32 2.0, %v433_v18 }
 0x2b9   :  { %v450_v20 = vsel %vm448_vm11, %v437_v19, -1e+30 }
 0x2ba   :  { %v455_v21 = vsel %vm451_vm9, %v450_v20, -inf }
 0x2bb   :  { %456 = vmax.xlane.f32.xlu1 %v455_v21 }
 0x326   :  { %v454_v22 = vpop.xlane.xlu1 %453 }
 0x327   :  { %v458_v23 = vsub.f32 %v449_v16, %v454_v22 }
 0x329   :  { %v460_v24 = vmul.f32 1.442695, %v458_v23 }
 0x32b   :  { %543 = vpow2.f32 %v460_v24 }
 0x32e   :  { %v457_v25 = vpop.xlane.xlu1 %456 }
 0x32f   :  { %v459_v26 = vsub.f32 %v450_v20, %v457_v25 }
 0x331   :  { %v544_v27 = vpop.eup %543  ;;  %v462_v28 = vmul.f32 1.442695, %v459_v26 }
 0x332   :  { %v464_v29 = vsel %vm451_vm9, %v544_v27, 0.0 }
 0x333   :  { %545 = vpow2.f32 %v462_v28  ;;  %465 = vadd.xlane.f32.xlu2 %v464_v29 }
 0x339   :  { %v546_v30 = vpop.eup %545 }
 0x33a   :  { %v467_v31 = vsel %vm451_vm9, %v546_v30, 0.0 }
 0x33b   :  { %468 = vadd.xlane.f32.xlu2 %v467_v31 }
 0x3a6   :  { %v466_v32 = vpop.xlane.xlu2 %465 }
 0x3a7   :  { %547 = vlog2.f32 %v466_v32 }
 0x3ad   :  { %v548_v37 = vpop.eup %547 }
 0x3ae   :  { %v469_v36 = vpop.xlane.xlu2 %468  ;;  %v471_v39 = vmul.f32 0.6931472, %v548_v37 }
 0x3af   :  { %549 = vlog2.f32 %v469_v36 }
 0x3b0   :  { %v474_v43 = vadd.f32 %v471_v39, %v454_v22 }
 0x3b5   :  { %v550_v40 = vpop.eup %549 }
 0x3b6   :  { %v473_v42 = vmul.f32 0.6931472, %v550_v40 }
 0x3b8   :  { %v475_v44 = vadd.f32 %v473_v42, %v457_v25 }
 0x3ba   :  { %v483_v46 = vadd.f32 %v475_v44, %v474_v43 }
 0x3bc   :  { %v484_v48 = vrot.slane %v483_v46, 4 }
 0x3be   :  { %v485_v47 = vadd.f32 %v484_v48, %v483_v46 }
 0x3c0   :  { %v486_v50 = vrot.slane %v485_v47, 2 }
 0x3c2   :  { %v487_v52 = vadd.f32 %v486_v50, %v485_v47 }
 0x3c4   :  { %v488_v53 = vrot.slane %v487_v52, 1 }
 0x3c6   :  { %v489_v55 = vadd.f32 %v488_v53, %v487_v52 }
 0x3c8   :  { %v498_v57 = vsub.f32 %v489_v55, %v497_v54 }
 0x3ca   :  { %v499_v58 = vmul.f32 0.125, %v498_v57 }
 0x3cc   :  { %501 = vst.msk [vmem:[#allocation8] sm:$0x1] %vm500_vm12, %v499_v58 }
 0x3cd   :  { %512 = dma.vmem_to_hbm [thread:$0]  %s508_s17, 16, %s510_s20, [#allocation4]  }
 0x3ce   :  { %651 = dma.done.wait [#allocation4], 16  }
 0x3cf   :  { %652 = vsyncadd [#allocation4], 4294967280 }
 0x3d0   :  { %517 = vsyncpa [#allocation3], 1 }
 0x3d1   :  { %518 = vsyncpa [#allocation6], 1 }
 0x3d2   :  { %519 = vsyncpa [#allocation4], 1 }

</bundles_post_ra>
